<compile_context>
chip_gen: v7x
topology: tpu7x:2x2x1
jax: 0.10.0
libtpu: 0.0.40
codegen_flags: <defaults>
</compile_context>

<pallas_src>
import jax
import jax.numpy as jnp
from jax.experimental import pallas as pl
from jax.experimental.pallas import tpu as pltpu


def _round_up(n: int, m: int) -> int:
    return ((n + m - 1) // m) * m


def _pick_block_rows(batch: int, d: int) -> int:
    """Batch-tile rows: ~2 MiB of lane-padded f32 x per tile, multiple of 1024
    (so tb//128 is a multiple of 8 for the lane-dense output block), and at
    least 2 grid steps for large batches (v7x has 2 TensorCores)."""
    lane_d = max(d, 128)                      # x is lane-padded to 128 in VMEM
    target = (2 << 20) // (4 * lane_d)        # rows for ~2 MiB f32 x tile
    tb = min(8192, max(1024, (target // 1024) * 1024))
    bp = _round_up(batch, 128)
    if bp <= tb:
        if batch >= 2048:
            # One tile would cover the whole batch: split so the "parallel"
            # batch axis has >= 2 steps (each half still >= 1024 rows).
            tb = _round_up(-(-batch // 2), 1024)
        else:
            # Single step; block extents equal the (128-padded) full extents,
            # which satisfies the (8,128) block-shape rule.
            tb = bp
    return tb


def _critic_kernel(x_ref, w1_ref, b1_ref, w2_ref, b2_ref, o_ref):
    # ---- Layer 1: MXU matmul, bf16 operands, f32 accumulation --------------
    x_bf = x_ref[...].astype(jnp.bfloat16)                  # no-op if x is bf16
    h = jnp.dot(x_bf, w1_ref[...],                          # [TB, Hp] f32
                preferred_element_type=jnp.float32)
    h = jnp.maximum(h + b1_ref[...], 0.0)                   # bias + ReLU (VPU)

    # ---- Layer 2 (single output unit): VPU multiply + lane reduction -------
    # Regroup rows into (TB//128, 128, Hp) so the reduced result is a
    # lane-dense (TB//128, 128) block (full unmasked vst on writeback).
    # The 64->128 hidden padding is kept: it exactly fills one lane group and
    # is free while the kernel is HBM-bound on x (pure slot filler).
    rows = x_ref.shape[0]
    hp = h.shape[-1]
    h3 = h.reshape(rows // 128, 128, hp)
    y = jnp.sum(h3 * w2_ref[...], axis=-1) + b2_ref[0, 0]   # [TB//128, 128]
    o_ref[...] = y.astype(o_ref.dtype)


def critic_forward(x, w1, b1, w2, b2, *, block_rows=None, x_buffers: int = 2):
    """x: [B, input_size] f32 or bf16; w1: [in, 64]; b1: [1, 64] (or [64]);
    w2: [64, 1]; b2: [1, 1] (or scalar).

    Returns [B, 1] f32 (same math as PyTorch Linear->ReLU->Linear, with the
    first matmul using bf16 operands and f32 accumulation).
    """
    B, D = x.shape
    H = w1.shape[1]
    if w2.reshape(-1).shape[0] != H:
        raise ValueError("critic_forward only supports out_features == 1")
    Hp = _round_up(H, 128)                    # pad hidden 64 -> 128 (zeros)

    # Weights in kernel layout, VMEM-resident across all grid steps.
    w1p = jnp.zeros((D, Hp), jnp.bfloat16).at[:, :H].set(w1.astype(jnp.bfloat16))
    b1p = jnp.zeros((1, Hp), jnp.float32).at[:, :H].set(
        b1.reshape(1, H).astype(jnp.float32))
    w2p = jnp.zeros((1, Hp), jnp.float32).at[:, :H].set(
        w2.reshape(1, H).astype(jnp.float32))
    b2s = jnp.asarray(b2, jnp.float32).reshape(1, 1)

    # Batch tiling (no wrapper-side padding of x: rely on partial last blocks).
    tb = _pick_block_rows(B, D) if block_rows is None else min(
        _round_up(block_rows, 128), _round_up(B, 128))
    grid = (pl.cdiv(B, tb),)
    out_rows = pl.cdiv(B, 128)                # lane-dense output row groups

    if x_buffers > 2:
        # Optional: deeper pipelining on the x stream if a trace still shows
        # exposed DMA at tile boundaries (costs one extra x tile of VMEM).
        x_spec = pl.BlockSpec((tb, D), lambda i: (i, 0),
                              pipeline_mode=pl.Buffered(x_buffers))
    else:
        x_spec = pl.BlockSpec((tb, D), lambda i: (i, 0))

    out = pl.pallas_call(
        _critic_kernel,
        out_shape=jax.ShapeDtypeStruct((out_rows, 128), jnp.float32),
        grid=grid,
        in_specs=[
            x_spec,                                           # x: tiled over batch
            pl.BlockSpec((D, Hp), lambda i: (0, 0)),          # w1: VMEM-resident
            pl.BlockSpec((1, Hp), lambda i: (0, 0)),          # b1: VMEM-resident
            pl.BlockSpec((1, Hp), lambda i: (0, 0)),          # w2 row: VMEM-resident
            pl.BlockSpec(memory_space=pltpu.MemorySpace.SMEM),  # b2: SMEM scalar
        ],
        out_specs=pl.BlockSpec((tb // 128, 128), lambda i: (i, 0)),
        compiler_params=pltpu.CompilerParams(
            dimension_semantics=("parallel",),    # megacore split on v7x
            vmem_limit_bytes=32 * 1024 * 1024,    # ~8 MiB used at default tiles
        ),
    )(x, w1p, b1p, w2p, b2s)

    # Lane-dense slab -> PyTorch-shaped (B, 1) output.  Rows beyond B come
    # from undefined partial-block input rows and are discarded here.
    return out.reshape(out_rows * 128, 1)[:B]


def init_critic_params(key, input_size, hidden=64, out=1):
    """Deterministic init mirroring PyTorch nn.Linear (uniform +/- 1/sqrt(fan_in))."""
    k1, k2, k3, k4 = jax.random.split(key, 4)
    bound1 = 1.0 / jnp.sqrt(float(input_size))
    bound2 = 1.0 / jnp.sqrt(float(hidden))
    w1 = jax.random.uniform(k1, (input_size, hidden), jnp.float32, -bound1, bound1)
    b1 = jax.random.uniform(k2, (1, hidden), jnp.float32, -bound1, bound1)
    w2 = jax.random.uniform(k3, (hidden, out), jnp.float32, -bound2, bound2)
    b2 = jax.random.uniform(k4, (1, out), jnp.float32, -bound2, bound2)
    return w1, b1, w2, b2


if __name__ == "__main__":
    key = jax.random.PRNGKey(0)
    k_in, k_params = jax.random.split(key)

    batch = 8
    input_size = 32

    x = jax.random.normal(k_in, (batch, input_size), dtype=jnp.float32)
    w1, b1, w2, b2 = init_critic_params(k_params, input_size)

    out = jax.block_until_ready(critic_forward(x, w1, b1, w2, b2))

    # Pure-JAX reference with the same bf16-operand / f32-accumulation layer 1.
    h_ref = jnp.maximum(
        jnp.dot(x.astype(jnp.bfloat16), w1.astype(jnp.bfloat16),
                preferred_element_type=jnp.float32) + b1, 0.0)
    ref = h_ref @ w2 + b2

    assert out.shape == (batch, 1)
    assert jnp.allclose(out, ref, atol=1e-4, rtol=1e-4), "mismatch vs reference"

    print("KERNEL_OK")
</pallas_src>

<mosaic_0001>
module attributes {stable_mosaic.version = 11 : i64} {
  func.func @_critic_kernel(%arg0: i32, %arg1: memref<128x32xf32, #tpu.memory_space<vmem>>, %arg2: memref<32x128xbf16, #tpu.memory_space<vmem>>, %arg3: memref<1x128xf32, #tpu.memory_space<vmem>>, %arg4: memref<1x128xf32, #tpu.memory_space<vmem>>, %arg5: memref<1x1xf32, #tpu.memory_space<smem>>, %arg6: memref<1x128xf32, #tpu.memory_space<vmem>>) attributes {dimension_semantics = [#tpu.dimension_semantics<parallel>], iteration_bounds = array<i64: 1>, scalar_prefetch = 0 : i64, scratch_operands = 0 : i64, tpu.core_type = #tpu.core_type<tc>, window_params = [{transform_indices = @transform_0, window_bounds = array<i64: 128, 32>}, {pipeline_mode = #tpu.pipeline_mode<synchronous>, transform_indices = @transform_1, window_bounds = array<i64: 32, 128>}, {pipeline_mode = #tpu.pipeline_mode<synchronous>, transform_indices = @transform_2, window_bounds = array<i64: 1, 128>}, {pipeline_mode = #tpu.pipeline_mode<synchronous>, transform_indices = @transform_3, window_bounds = array<i64: 1, 128>}, {transform_indices = @transform_4, window_bounds = array<i64: 1, 1>}, {transform_indices = @transform_5, window_bounds = array<i64: 1, 128>}]} {
    %c0 = arith.constant 0 : index
    %c0_0 = arith.constant 0 : index
    %0 = vector.load %arg1[%c0, %c0_0] : memref<128x32xf32, #tpu.memory_space<vmem>>, vector<128x32xf32>
    %1 = arith.truncf %0 : vector<128x32xf32> to vector<128x32xbf16>
    %c0_1 = arith.constant 0 : index
    %c0_2 = arith.constant 0 : index
    %2 = vector.load %arg2[%c0_1, %c0_2] : memref<32x128xbf16, #tpu.memory_space<vmem>>, vector<32x128xbf16>
    %cst = arith.constant dense<0.000000e+00> : vector<128x128xf32>
    %3 = tpu.matmul %1, %2, %cst {dimension_numbers = #tpu.dot_dimension_numbers<[1], [0], [0], [1], [0, 0, 1, 1], [], []>} : vector<128x32xbf16>, vector<32x128xbf16>, vector<128x128xf32> -> vector<128x128xf32>
    %c0_3 = arith.constant 0 : index
    %c0_4 = arith.constant 0 : index
    %4 = vector.load %arg3[%c0_3, %c0_4] : memref<1x128xf32, #tpu.memory_space<vmem>>, vector<1x128xf32>
    %5 = vector.broadcast %4 : vector<1x128xf32> to vector<128x128xf32>
    %6 = arith.addf %3, %5 : vector<128x128xf32>
    %cst_5 = arith.constant 0.000000e+00 : f32
    %7 = vector.broadcast %cst_5 : f32 to vector<128x128xf32>
    %8 = arith.maximumf %6, %7 : vector<128x128xf32>
    %9 = vector.shape_cast %8 : vector<128x128xf32> to vector<1x128x128xf32>
    %c0_6 = arith.constant 0 : index
    %c0_7 = arith.constant 0 : index
    %10 = vector.load %arg4[%c0_6, %c0_7] : memref<1x128xf32, #tpu.memory_space<vmem>>, vector<1x128xf32>
    %11 = vector.shape_cast %10 : vector<1x128xf32> to vector<1x1x128xf32>
    %12 = vector.broadcast %11 : vector<1x1x128xf32> to vector<1x128x128xf32>
    %13 = arith.mulf %9, %12 : vector<1x128x128xf32>
    %cst_8 = arith.constant dense<0.000000e+00> : vector<1x128xf32>
    %14 = vector.multi_reduction <add>, %13, %cst_8 [2] : vector<1x128x128xf32> to vector<1x128xf32>
    %c0_9 = arith.constant 0 : index
    %c0_10 = arith.constant 0 : index
    %15 = memref.load %arg5[%c0_9, %c0_10] : memref<1x1xf32, #tpu.memory_space<smem>>
    %16 = vector.broadcast %15 : f32 to vector<1x128xf32>
    %17 = arith.addf %14, %16 : vector<1x128xf32>
    %c0_11 = arith.constant 0 : index
    %c0_12 = arith.constant 0 : index
    %18 = vector.load %arg6[%c0_11, %c0_12] : memref<1x128xf32, #tpu.memory_space<vmem>>, vector<1x128xf32>
    tpu.vector_store %arg6[%c0_11, %c0_12], %17 {strides = array<i32>} : memref<1x128xf32, #tpu.memory_space<vmem>>, vector<1x128xf32>,
    return
  }
  func.func @transform_0(%arg0: i32) -> (i32, i32) {
    %c0_i32 = arith.constant 0 : i32
    %c0_i32_0 = arith.constant 0 : i32
    return %arg0, %c0_i32 : i32, i32
  }
  func.func @transform_1(%arg0: i32) -> (i32, i32) {
    %c0_i32 = arith.constant 0 : i32
    %c0_i32_0 = arith.constant 0 : i32
    %c0_i32_1 = arith.constant 0 : i32
    return %c0_i32, %c0_i32_0 : i32, i32
  }
  func.func @transform_2(%arg0: i32) -> (i32, i32) {
    %c0_i32 = arith.constant 0 : i32
    %c0_i32_0 = arith.constant 0 : i32
    %c0_i32_1 = arith.constant 0 : i32
    return %c0_i32, %c0_i32_0 : i32, i32
  }
  func.func @transform_3(%arg0: i32) -> (i32, i32) {
    %c0_i32 = arith.constant 0 : i32
    %c0_i32_0 = arith.constant 0 : i32
    %c0_i32_1 = arith.constant 0 : i32
    return %c0_i32, %c0_i32_0 : i32, i32
  }
  func.func @transform_4(%arg0: i32) -> (i32, i32) {
    %c0_i32 = arith.constant 0 : i32
    %c0_i32_0 = arith.constant 0 : i32
    %c0_i32_1 = arith.constant 0 : i32
    return %c0_i32, %c0_i32_0 : i32, i32
  }
  func.func @transform_5(%arg0: i32) -> (i32, i32) {
    %c0_i32 = arith.constant 0 : i32
    %c0_i32_0 = arith.constant 0 : i32
    return %arg0, %c0_i32 : i32, i32
  }
}

</mosaic_0001>

<bundles_post_ra>
// kernel: tpu_custom_call.1
= control target key start
LH: loop header
LB: loop body
LE: loop exit
PB: predicated region body
PF: predicated region fallthrough
CT: control target
= control target key end

     0   :  { %11 = vsyncpa [#allocation4], 0  ;;  %s772_s0 = inlined_call_operand.hbm [shape: f32[8,32], index: 0, kind: input, shape index: {}]   ;;  %s773_s1 = inlined_call_operand.hbm [shape: bf16[32,128], index: 1, kind: input, shape index: {}]   ;;  %s774_s2 = inlined_call_operand.vmem [shape: f32[1,128], index: 2, kind: input, shape index: {}]   ;;  %s775_s3 = inlined_call_operand.vmem [shape: f32[1,128], index: 3, kind: input, shape index: {}]   ;;  %s776_s4 = inlined_call_operand.<no memory space> [shape: f32[1,1], index: 4, kind: input, shape index: {}]   ;;  %s777_s5 = inlined_call_operand.hbm [shape: f32[1,128], index: 5, kind: output, shape index: {}]  }
   0x1   :  { %12 = vsyncpa [#allocation7], 0 }
   0x2   :  { %13 = vsyncpa [#allocation5], 0 }
   0x3   :  { %18 = vsyncadd [#allocation4], 1920  ;;  %s581_s18 = smov [#allocation3]   ;;  %s509_s22 = scalar_lea.hbm %s772_s0, 128 }
   0x4   :  { %s19_s19 = sshll.u32 %s581_s18, 4  ;;  %p510_p0 = scmp.ne.s32.totalorder %s772_s0, %s509_s22  ;;  %s20_s19 = int_to_ptr.vmem [resolvable:$true] %s19_s19 }
   0x5   :  { %p513_p1 = scmp.lt.u32.totalorder %s509_s22, %s772_s0 }
   0x7   :  { %p515_p2 = pnand %p513_p1, %p510_p0 }
   0x9   :  { %518 = shalt.err (!%p515_p2)
}
   0xa   :  { %s519_s27 = scalar_lea.vmem %s20_s19, 128  ;;  %s523_s28 = scalar_lea.vmem %s20_s19, 2048 }
   0xb   :  { %p520_p3 = scmp.ne.s32.totalorder %s20_s19, %s519_s27  ;;  %p524_p4 = scmp.lt.s32.totalorder %s20_s19, %s20_s19 }
   0xc   :  { %p525_p5 = scmp.lt.s32.totalorder %s523_s28, %s519_s27 }
   0xe   :  { %p526_p6 = por %p525_p5, %p524_p4 }
  0x10   :  { %p527_p7 = pnand %p526_p6, %p520_p3 }
  0x12   :  { %530 = shalt.err (!%p527_p7)
}
  0x13   :  { %s582_s29 = smov 128   ;;  %s583_s30 = smov 8  }
  0x14   :  { %25 = dma.hbm_to_vmem [thread:$0]  %s772_s0, 128, %s20_s19, [#allocation4], %s582_s29, %s582_s29, %s583_s30  }
  0x15   :  { %s584_s8 = smov [#allocation6]   ;;  %s531_s12 = scalar_lea.hbm %s773_s1, 256 }
  0x16   :  { %s31_s9 = sshll.u32 %s584_s8, 4  ;;  %p532_p8 = scmp.ne.s32.totalorder %s773_s1, %s531_s12  ;;  %s32_s9 = int_to_ptr.vmem [resolvable:$true] %s31_s9 }
  0x17   :  { %p535_p9 = scmp.lt.u32.totalorder %s531_s12, %s773_s1 }
  0x19   :  { %p537_p10 = pnand %p535_p9, %p532_p8 }
  0x1b   :  { %540 = shalt.err (!%p537_p10)
}
  0x1c   :  { %s541_s17 = scalar_lea.vmem %s32_s9, 256  ;;  %p546_p12 = scmp.lt.s32.totalorder %s32_s9, %s32_s9 }
  0x1d   :  { %p542_p11 = scmp.ne.s32.totalorder %s32_s9, %s541_s17  ;;  %p547_p13 = scmp.lt.s32.totalorder %s541_s17, %s541_s17 }
  0x1f   :  { %p548_p0 = por %p547_p13, %p546_p12 }
  0x21   :  { %p549_p1 = pnand %p548_p0, %p542_p11 }
  0x23   :  { %552 = shalt.err (!%p549_p1)
}
  0x24   :  { %s585_s0 = smov 64   ;;  %s586_s18 = smov 4  }
  0x25   :  { %37 = dma.hbm_to_vmem [thread:$0]  %s773_s1, 256, %s32_s9, [#allocation7], %s585_s0, %s585_s0, %s586_s18  }
  0x26   :  { %575 = dma.done.wait [#allocation4], 2048  }
  0x27   :  { %576 = vsyncadd [#allocation4], 4294965248 }
  0x28   :  { %577 = dma.done.wait [#allocation7], 256  }
  0x29   :  { %578 = vsyncadd [#allocation7], 4294967040  ;;  %v507_v0 = vld [vmem:[#allocation6] sm:$0xff]   ;;  %v508_v1 = vld [vmem:[#allocation6 + $0x8] sm:$0xff]   ;;  %vm98_vm0 = vcmask 261120   ;;  %vm336_vm1 = vcmask 130112  }
  0x2a   :  { %476 = vmatprep.subr.bf16.mxu0 %v507_v0  ;;  %496 = vmatprep.subr.bf16.mxu1 %v507_v0  ;;  %v51_v2 = vld [vmem:[#allocation3] sm:$0xff]  ;;  %v52_v3 = vld [vmem:[#allocation3 + $0x8] sm:$0xff]  ;;  %v53_v4 = vld [vmem:[#allocation3 + $0x10] sm:$0xff]  ;;  %vm343_vm2 = vcmask 195712   ;;  %vm350_vm3 = vcmask 261312   ;;  %vm357_vm4 = vcmask 326912  }
  0x2b   :  { %477 = vmatpush3.bf16.msra.mxu0 %v507_v0  ;;  %498 = vmatpush3.bf16.msra.mxu1 %v507_v0  ;;  %v67_v5 = vpack.c.bf16 %v52_v3, %v51_v2  ;;  %v54_v6 = vld [vmem:[#allocation3 + $0x18] sm:$0xff]  ;;  %v59_v7 = vld [vmem:[#allocation3 + $0x40] sm:$0xff]  ;;  %v60_v8 = vld [vmem:[#allocation3 + $0x48] sm:$0xff]  ;;  %vm364_vm5 = vcmask 392512   ;;  %vm371_vm6 = vcmask 458112   ;;  %vm378_vm7 = vcmask 523712  }
  0x2c   :  { %478 = vmatprep.subr.bf16.mxu0 %v508_v1  ;;  %497 = vmatprep.subr.bf16.mxu1 %v508_v1  ;;  %v71_v9 = vpack.c.bf16 %v60_v8, %v59_v7  ;;  %v61_v10 = vld [vmem:[#allocation3 + $0x50] sm:$0xff]  ;;  %v62_v11 = vld [vmem:[#allocation3 + $0x58] sm:$0xff]  ;;  %v55_v12 = vld [vmem:[#allocation3 + $0x20] sm:$0xff]  ;;  %v68_v14 = vpack.c.bf16 %v54_v6, %v53_v4  ;;  %vm385_vm8 = vcmask 589312   ;;  %vm392_vm9 = vcmask 654912  }
  0x2d   :  { %480 = vmatprep.mubr.msk.bf16.mxu0 %vm98_vm0, %v67_v5  ;;  %v56_v13 = vld [vmem:[#allocation3 + $0x28] sm:$0xff]  ;;  %v72_v15 = vpack.c.bf16 %v62_v11, %v61_v10  ;;  %v63_v16 = vld [vmem:[#allocation3 + $0x60] sm:$0xff]  ;;  %v57_v20 = vld [vmem:[#allocation3 + $0x30] sm:$0xff]  ;;  %vm399_vm10 = vcmask 720512   ;;  %vm406_vm11 = vcmask 786112   ;;  %vm413_vm12 = vcmask 851712  }
  0x2e   :  { %488 = vmatprep.mubr.msk.bf16.mxu1 %vm98_vm0, %v71_v9  ;;  %v64_v17 = vld [vmem:[#allocation3 + $0x68] sm:$0xff]  ;;  %v69_v18 = vpack.c.bf16 %v56_v13, %v55_v12  ;;  %v58_v21 = vld [vmem:[#allocation3 + $0x38] sm:$0xff]  ;;  %v65_v22 = vld [vmem:[#allocation3 + $0x70] sm:$0xff]  ;;  %vm420_vm13 = vcmask 917312   ;;  %vm427_vm14 = vcmask 982912   ;;  %vm434_vm15 = vcmask 1048512  }
  0x2f   :  { %479 = vmatpush3.bf16.msra.mxu0 %v508_v1  ;;  %499 = vmatpush3.bf16.msra.mxu1 %v508_v1  ;;  %v73_v19 = vpack.c.bf16 %v64_v17, %v63_v16  ;;  %v66_v23 = vld [vmem:[#allocation3 + $0x78] sm:$0xff]  ;;  %v70_v24 = vpack.c.bf16 %v58_v21, %v57_v20  ;;  %v653_v26 = vld [vmem:[%s774_s2] ss:$0 sm:$0xff] }
  0x30   :  { %v74_v25 = vpack.c.bf16 %v66_v23, %v65_v22  ;;  %v661_v36 = vld [vmem:[%s775_s3] ss:$0 sm:$0xff] }
  0x32   :  { %481 = vmatmul.mubr.msk.bf16.vlgmr.msra.gmra.mrb[0].mxu0 %vm98_vm0, %v68_v14  ;;  %489 = vmatmul.mubr.msk.bf16.vlgmr.msra.gmra.mrb[0].mxu1 %vm98_vm0, %v72_v15 }
  0x33   :  { %484 = vmatprep.mubr.msk.bf16.mxu0 %vm98_vm0, %v69_v18  ;;  %492 = vmatprep.mubr.msk.bf16.mxu1 %vm98_vm0, %v73_v19 }
  0x3a   :  { %485 = vmatmul.mubr.msk.bf16.gmra.mrb[4].mxu0 %vm98_vm0, %v70_v24  ;;  %493 = vmatmul.mubr.msk.bf16.gmra.mrb[4].mxu1 %vm98_vm0, %v74_v25 }
 0x105   :  { %v482_v27 = vpop.f32.mrb[0].mxu0  ;;  %v490_v28 = vpop.f32.mrb[0].mxu1 }
 0x106   :  { %v166_v29 = vadd.f32 %v482_v27, %v653_v26  ;;  %v157_v30 = vpop.f32.mrb[1].mxu0  ;;  %v189_v31 = vpop.f32.mrb[1].mxu1  ;;  %v198_v8 = vadd.f32 %v490_v28, %v653_v26 }
 0x107   :  { %v158_v32 = vadd.f32 %v653_v26, %v157_v30  ;;  %v483_v33 = vpop.f32.mrb[2].mxu0  ;;  %v190_v34 = vadd.f32 %v653_v26, %v189_v31  ;;  %v491_v35 = vpop.f32.mrb[2].mxu1 }
 0x108   :  { %v222_v37 = vmax.f32 %v166_v29, 0.0  ;;  %v169_v38 = vadd.f32 %v483_v33, %v653_v26  ;;  %v160_v39 = vpop.f32.mrb[3].mxu0  ;;  %v192_v40 = vpop.f32.mrb[3].mxu1  ;;  %v201_v6 = vadd.f32 %v491_v35, %v653_v26  ;;  %v230_v13 = vmax.f32 %v198_v8, 0.0 }
 0x109   :  { %v220_v41 = vmax.f32 %v158_v32, 0.0  ;;  %v228_v42 = vmax.f32 %v190_v34, 0.0  ;;  %v193_v44 = vadd.f32 %v653_v26, %v192_v40  ;;  %v161_v46 = vadd.f32 %v653_v26, %v160_v39 }
 0x10a   :  { %v223_v43 = vmax.f32 %v169_v38, 0.0  ;;  %v245_v45 = vmul.f32 %v661_v36, %v222_v37  ;;  %v231_v11 = vmax.f32 %v201_v6, 0.0  ;;  %v253_v21 = vmul.f32 %v661_v36, %v230_v13 }
 0x10b   :  { %v243_v47 = vmul.f32 %v661_v36, %v220_v41  ;;  %v251_v49 = vmul.f32 %v661_v36, %v228_v42  ;;  %v229_v51 = vmax.f32 %v193_v44, 0.0  ;;  %v221_v56 = vmax.f32 %v161_v46, 0.0 }
 0x10c   :  { %263 = vadd.xlane.f32.xlu1 %v245_v45  ;;  %v246_v54 = vmul.f32 %v661_v36, %v223_v43  ;;  %v254_v18 = vmul.f32 %v661_v36, %v231_v11  ;;  %v700_v37 = vstv %s776_s4  ;;  %s587_s4 = smov [#allocation8]  }
 0x10d   :  { %259 = vadd.xlane.f32.xlu0 %v243_v47  ;;  %v486_v48 = vpop.f32.mrb[4].mxu0  ;;  %v494_v50 = vpop.f32.mrb[4].mxu1  ;;  %v252_v1 = vmul.f32 %v661_v36, %v229_v51  ;;  %v244_v3 = vmul.f32 %v661_v36, %v221_v56  ;;  %s444_s24 = sshll.u32 %s587_s4, 4  ;;  %s445_s24 = int_to_ptr.vmem [resolvable:$true] %s444_s24 }
 0x10e   :  { %v182_v52 = vadd.f32 %v486_v48, %v653_v26  ;;  %v173_v53 = vpop.f32.mrb[5].mxu0  ;;  %v205_v55 = vpop.f32.mrb[5].mxu1  ;;  %v214_v19 = vadd.f32 %v494_v50, %v653_v26  ;;  %s553_s25 = scalar_lea.vmem %s445_s24, 16  ;;  %s557_s26 = scalar_lea.vmem %s445_s24, 32 }
 0x10f   :  { %v487_v57 = vpop.f32.mrb[6].mxu0  ;;  %v495_v58 = vpop.f32.mrb[6].mxu1  ;;  %v174_v2 = vadd.f32 %v653_v26, %v173_v53  ;;  %v206_v14 = vadd.f32 %v653_v26, %v205_v55  ;;  %p554_p2 = scmp.ne.s32.totalorder %s445_s24, %s553_s25  ;;  %p558_p3 = scmp.lt.s32.totalorder %s445_s24, %s445_s24 }
 0x110   :  { %265 = vadd.xlane.f32.xlu1 %v246_v54  ;;  %v185_v59 = vadd.f32 %v487_v57, %v653_v26  ;;  %v176_v60 = vpop.f32.mrb[7].mxu0  ;;  %v208_v61 = vpop.f32.mrb[7].mxu1  ;;  %v226_v62 = vmax.f32 %v182_v52, 0.0  ;;  %v217_v17 = vadd.f32 %v495_v58, %v653_v26  ;;  %v234_v24 = vmax.f32 %v214_v19, 0.0  ;;  %p559_p4 = scmp.lt.s32.totalorder %s557_s26, %s553_s25 }
 0x111   :  { %275 = vadd.xlane.f32.xlu0 %v251_v49  ;;  %v177_v0 = vadd.f32 %v653_v26, %v176_v60  ;;  %v224_v9 = vmax.f32 %v174_v2, 0.0  ;;  %v209_v10 = vadd.f32 %v653_v26, %v208_v61  ;;  %v232_v20 = vmax.f32 %v206_v14, 0.0 }
 0x112   :  { %v227_v63 = vmax.f32 %v185_v59, 0.0  ;;  %v249_v5 = vmul.f32 %v661_v36, %v226_v62  ;;  %v235_v23 = vmax.f32 %v217_v17, 0.0  ;;  %v257_v28 = vmul.f32 %v661_v36, %v234_v24  ;;  %p560_p5 = por %p559_p4, %p558_p3 }
 0x113   :  { %v225_v7 = vmax.f32 %v177_v0, 0.0  ;;  %v247_v15 = vmul.f32 %v661_v36, %v224_v9  ;;  %v233_v16 = vmax.f32 %v209_v10, 0.0  ;;  %v255_v25 = vmul.f32 %v661_v36, %v232_v20 }
 0x114   :  { %277 = vadd.xlane.f32.xlu1 %v252_v1  ;;  %v250_v4 = vmul.f32 %v661_v36, %v227_v63  ;;  %v258_v27 = vmul.f32 %v661_v36, %v235_v23  ;;  %v325_v26 = vlaneseq  ;;  %p561_p6 = pnand %p560_p5, %p554_p2 }
 0x115   :  { %261 = vadd.xlane.f32.xlu0 %v244_v3  ;;  %v248_v12 = vmul.f32 %v661_v36, %v225_v7  ;;  %v256_v22 = vmul.f32 %v661_v36, %v233_v16 }
 0x116   :  { %v692_v31 = vand.u32 127, %v325_v26  ;;  %v695_v34 = vshrl.u32 %v325_v26, 7 }
 0x118   :  { %273 = vadd.xlane.f32.xlu1 %v250_v4  ;;  %v331_v33 = vadd.s32 4294967288, %v692_v31  ;;  %v338_v36 = vadd.s32 4294967280, %v692_v31  ;;  %v329_v40 = vsub.s32 %v692_v31, %v695_v34  ;;  %v345_v42 = vadd.s32 4294967272, %v692_v31 }
 0x119   :  { %271 = vadd.xlane.f32.xlu0 %v249_v5  ;;  %v380_v43 = vadd.s32 4294967232, %v692_v31  ;;  %v710_v45 = vadd.s32 4294967224, %v692_v31  ;;  %v373_v47 = vadd.s32 4294967240, %v692_v31  ;;  %v366_v48 = vadd.s32 4294967248, %v692_v31 }
 0x11a   :  { %v334_v39 = vsub.s32 %v331_v33, %v695_v34  ;;  %v341_v49 = vsub.s32 %v338_v36, %v695_v34  ;;  %v359_v53 = vadd.s32 4294967256, %v692_v31  ;;  %v352_v54 = vadd.s32 4294967264, %v692_v31 }
 0x11b   :  { %v348_v56 = vsub.s32 %v345_v42, %v695_v34  ;;  %v383_v57 = vsub.s32 %v380_v43, %v695_v34  ;;  %v390_v59 = vsub.s32 %v710_v45, %v695_v34  ;;  %v376_v60 = vsub.s32 %v373_v47, %v695_v34 }
 0x11c   :  { %269 = vadd.xlane.f32.xlu1 %v248_v12  ;;  %v369_v61 = vsub.s32 %v366_v48, %v695_v34  ;;  %v401_v0 = vadd.s32 4294967208, %v692_v31  ;;  %v394_v1 = vadd.s32 4294967216, %v692_v31  ;;  %v362_v3 = vsub.s32 %v359_v53, %v695_v34 }
 0x11d   :  { %267 = vadd.xlane.f32.xlu0 %v247_v15  ;;  %v355_v5 = vsub.s32 %v352_v54, %v695_v34  ;;  %v415_v11 = vadd.s32 4294967192, %v692_v31  ;;  %v408_v19 = vadd.s32 4294967200, %v692_v31  ;;  %v429_v42 = vadd.s32 4294967176, %v692_v31 }
 0x11e   :  { %v404_v14 = vsub.s32 %v401_v0, %v695_v34  ;;  %v397_v15 = vsub.s32 %v394_v1, %v695_v34 }
 0x11f   :  { %v411_v36 = vsub.s32 %v408_v19, %v695_v34 }
 0x120   :  { %281 = vadd.xlane.f32.xlu1 %v254_v18 }
 0x121   :  { %279 = vadd.xlane.f32.xlu0 %v253_v21 }
 0x124   :  { %285 = vadd.xlane.f32.xlu1 %v256_v22 }
 0x125   :  { %283 = vadd.xlane.f32.xlu0 %v255_v25 }
 0x128   :  { %289 = vadd.xlane.f32.xlu1 %v258_v27 }
 0x129   :  { %287 = vadd.xlane.f32.xlu0 %v257_v28  ;;  %v418_v28 = vsub.s32 %v415_v11, %v695_v34 }
 0x199   :  { %v264_v29 = vpop.xlane.xlu1 %263 }
 0x19a   :  { %v260_v30 = vpop.xlane.xlu0 %259  ;;  %v295_v50 = vadd.f32 %v700_v37, %v264_v29 }
 0x19b   :  { %v293_v41 = vadd.f32 %v700_v37, %v260_v30 }
 0x19c   :  { %v342_v2 = vrot.slane %v295_v50, %v341_v49 }
 0x19d   :  { %v266_v32 = vpop.xlane.xlu1 %265  ;;  %v330_v55 = vrot.slane %v293_v41, %v329_v40 }
 0x19e   :  { %v276_v35 = vpop.xlane.xlu0 %275  ;;  %v296_v62 = vadd.f32 %v700_v37, %v266_v32 }
 0x19f   :  { %v301_v16 = vadd.f32 %v700_v37, %v276_v35 }
 0x1a0   :  { %v349_v12 = vrot.slane %v296_v62, %v348_v56 }
 0x1a1   :  { %v278_v38 = vpop.xlane.xlu1 %277  ;;  %v384_v32 = vrot.slane %v301_v16, %v383_v57 }
 0x1a2   :  { %v262_v44 = vpop.xlane.xlu0 %261  ;;  %v302_v20 = vadd.f32 %v700_v37, %v278_v38  ;;  %v422_v38 = vadd.s32 4294967184, %v692_v31  ;;  %v432_v31 = vsub.s32 %v429_v42, %v695_v34 }
 0x1a3   :  { %v294_v46 = vadd.f32 %v700_v37, %v262_v44 }
 0x1a5   :  { %v335_v51 = vrot.slane %v294_v46, %v334_v39  ;;  %v274_v52 = vpop.xlane.xlu1 %273  ;;  %v391_v39 = vrot.slane %v302_v20, %v390_v59 }
 0x1a6   :  { %v272_v58 = vpop.xlane.xlu0 %271  ;;  %v300_v13 = vadd.f32 %v700_v37, %v274_v52  ;;  %v425_v52 = vsub.s32 %v422_v38, %v695_v34 }
 0x1a7   :  { %v337_v63 = vsel %vm336_vm1, %v335_v51, %v330_v55  ;;  %v299_v9 = vadd.f32 %v700_v37, %v272_v58 }
 0x1a8   :  { %v344_v8 = vsel %vm343_vm2, %v342_v2, %v337_v63  ;;  %v377_v26 = vrot.slane %v300_v13, %v376_v60 }
 0x1a9   :  { %v270_v4 = vpop.xlane.xlu1 %269  ;;  %v351_v22 = vsel %vm350_vm3, %v349_v12, %v344_v8  ;;  %v370_v24 = vrot.slane %v299_v9, %v369_v61 }
 0x1aa   :  { %v298_v6 = vadd.f32 %v700_v37, %v270_v4  ;;  %v268_v7 = vpop.xlane.xlu0 %267 }
 0x1ab   :  { %v297_v10 = vadd.f32 %v700_v37, %v268_v7 }
 0x1ac   :  { %v363_v21 = vrot.slane %v298_v6, %v362_v3 }
 0x1ad   :  { %v356_v17 = vrot.slane %v297_v10, %v355_v5  ;;  %v282_v18 = vpop.xlane.xlu1 %281 }
 0x1ae   :  { %v280_v23 = vpop.xlane.xlu0 %279  ;;  %v304_v30 = vadd.f32 %v700_v37, %v282_v18 }
 0x1af   :  { %v358_v25 = vsel %vm357_vm4, %v356_v17, %v351_v22  ;;  %v303_v27 = vadd.f32 %v700_v37, %v280_v23 }
 0x1b0   :  { %v365_v29 = vsel %vm364_vm5, %v363_v21, %v358_v25  ;;  %v405_v46 = vrot.slane %v304_v30, %v404_v14 }
 0x1b1   :  { %v372_v33 = vsel %vm371_vm6, %v370_v24, %v365_v29  ;;  %v286_v35 = vpop.xlane.xlu1 %285  ;;  %v398_v44 = vrot.slane %v303_v27, %v397_v15 }
 0x1b2   :  { %v379_v40 = vsel %vm378_vm7, %v377_v26, %v372_v33  ;;  %v284_v41 = vpop.xlane.xlu0 %283  ;;  %v306_v48 = vadd.f32 %v700_v37, %v286_v35 }
 0x1b3   :  { %v386_v43 = vsel %vm385_vm8, %v384_v32, %v379_v40  ;;  %v305_v45 = vadd.f32 %v700_v37, %v284_v41 }
 0x1b4   :  { %v393_v47 = vsel %vm392_vm9, %v391_v39, %v386_v43  ;;  %v419_v58 = vrot.slane %v306_v48, %v418_v28 }
 0x1b5   :  { %v400_v49 = vsel %vm399_vm10, %v398_v44, %v393_v47  ;;  %v412_v50 = vrot.slane %v305_v45, %v411_v36  ;;  %v290_v51 = vpop.xlane.xlu1 %289 }
 0x1b6   :  { %v407_v53 = vsel %vm406_vm11, %v405_v46, %v400_v49  ;;  %v308_v54 = vadd.f32 %v700_v37, %v290_v51  ;;  %v288_v55 = vpop.xlane.xlu0 %287 }
 0x1b7   :  { %v414_v56 = vsel %vm413_vm12, %v412_v50, %v407_v53  ;;  %v307_v57 = vadd.f32 %v700_v37, %v288_v55 }
 0x1b8   :  { %v433_v60 = vrot.slane %v308_v54, %v432_v31  ;;  %v421_v61 = vsel %vm420_vm13, %v419_v58, %v414_v56 }
 0x1b9   :  { %v426_v59 = vrot.slane %v307_v57, %v425_v52 }
 0x1bb   :  { %v428_v62 = vsel %vm427_vm14, %v426_v59, %v421_v61 }
 0x1bc   :  { %v435_v63 = vsel %vm434_vm15, %v433_v60, %v428_v62 }
 0x1bd   :  { %437 = vst [vmem:[#allocation8] sm:$0x1] %v435_v63 }
 0x1be   :  { %564 = shalt.err (!%p561_p6)
}
 0x1bf   :  { %s565_s29 = scalar_lea.hbm %s777_s5, 16 }
 0x1c0   :  { %p566_p7 = scmp.ne.s32.totalorder %s777_s5, %s565_s29  ;;  %p569_p8 = scmp.lt.u32.totalorder %s565_s29, %s777_s5 }
 0x1c2   :  { %p571_p9 = pnand %p569_p8, %p566_p7 }
 0x1c4   :  { %574 = shalt.err (!%p571_p9)
}
 0x1c5   :  { %447 = dma.vmem_to_hbm [thread:$0]  %s445_s24, 16, %s777_s5, [#allocation5]  }
 0x1c6   :  { %579 = dma.done.wait [#allocation5], 16  }
 0x1c7   :  { %580 = vsyncadd [#allocation5], 4294967280 }
 0x1c8   :  { %451 = vsyncpa [#allocation4], 1 }
 0x1c9   :  { %452 = vsyncpa [#allocation7], 1 }
 0x1ca   :  { %453 = vsyncpa [#allocation5], 1 }

</bundles_post_ra>
